<compile_context>
chip_gen: v7x
topology: tpu7x:2x2x1
jax: 0.10.0
libtpu: 0.0.40
codegen_flags: <defaults>
</compile_context>

<pallas_src>
import functools

import jax
import jax.numpy as jnp
from jax.experimental import pallas as pl
from jax.experimental.pallas import tpu as pltpu


def _round_up(x, m):
    return (x + m - 1) // m * m


def augru_kernel(x_ref, h_ref, a_ref, wi_ref, wh_ref, bi_ref, bh_ref, o_ref):
    x = x_ref[...]                       # (TR, D)   inputs tile
    h = h_ref[...]                       # (TR, H)   previous hidden tile
    a = a_ref[...]                       # (TR, 1)   attention score tile

    def gate(g):
        gi = jnp.dot(x, wi_ref[g], preferred_element_type=jnp.float32) + bi_ref[g]
        gh = jnp.dot(h, wh_ref[g], preferred_element_type=jnp.float32) + bh_ref[g]
        return gi, gh

    i_r, h_r = gate(0)
    r = jax.nn.sigmoid(i_r + h_r)        # reset gate

    i_z, h_z = gate(1)
    z = jax.nn.sigmoid(i_z + h_z)        # update gate

    i_n, h_n = gate(2)
    n = jnp.tanh(i_n + r * h_n)          # candidate state

    az = a * z                           # attentional update gate
    o_ref[...] = ((1.0 - az) * h + az * n).astype(o_ref.dtype)


@functools.partial(jax.jit, static_argnames=("tile_rows",))
def augru_cell(inputs, hx, att_score, w_ih, w_hh, b_ih, b_hh, *, tile_rows=512):
    """AUGRUCell forward.

    inputs:    (B, input_size)  float32
    hx:        (B, hidden_size) float32
    att_score: (B,) or (B, 1)   float32
    w_ih:      (3*H, input_size)   (PyTorch layout)
    w_hh:      (3*H, hidden_size)  (PyTorch layout)
    b_ih, b_hh:(3*H,)
    returns hy (B, hidden_size)
    """
    B, D = inputs.shape
    H = hx.shape[1]

    # --- wrapper-side weight re-layout: per-gate, transposed, stacked ---
    # (3, D, H) / (3, H, H): x @ wi[g] == F.linear(x, W_ih)[:, g*H:(g+1)*H]
    wi = jnp.transpose(w_ih.reshape(3, H, D), (0, 2, 1)).astype(jnp.float32)
    wh = jnp.transpose(w_hh.reshape(3, H, H), (0, 2, 1)).astype(jnp.float32)
    bi = b_ih.reshape(3, 1, H).astype(jnp.float32)
    bh = b_hh.reshape(3, 1, H).astype(jnp.float32)

    a = att_score.reshape(B, 1).astype(jnp.float32)
    x = inputs.astype(jnp.float32)
    h = hx.astype(jnp.float32)

    # --- row tiling: big tiles, padded batch so the grid divides evenly ---
    tr = min(tile_rows, _round_up(B, 8))
    rows = _round_up(B, tr)
    if rows != B:
        pad = rows - B
        x = jnp.pad(x, ((0, pad), (0, 0)))
        h = jnp.pad(h, ((0, pad), (0, 0)))
        a = jnp.pad(a, ((0, pad), (0, 0)))

    row_map = lambda i: (i, 0)
    const2 = lambda i: (0, 0, 0)

    out = pl.pallas_call(
        augru_kernel,
        out_shape=jax.ShapeDtypeStruct((rows, H), jnp.float32),
        grid_spec=pltpu.PrefetchScalarGridSpec(
            num_scalar_prefetch=0,
            grid=(rows // tr,),
            in_specs=[
                pl.BlockSpec((tr, D), row_map),          # inputs
                pl.BlockSpec((tr, H), row_map),          # hx
                pl.BlockSpec((tr, 1), row_map),          # att_score
                pl.BlockSpec((3, D, H), const2),         # W_ih (per-gate, transposed)
                pl.BlockSpec((3, H, H), const2),         # W_hh (per-gate, transposed)
                pl.BlockSpec((3, 1, H), const2),         # b_ih
                pl.BlockSpec((3, 1, H), const2),         # b_hh
            ],
            out_specs=pl.BlockSpec((tr, H), row_map),
        ),
        compiler_params=pltpu.CompilerParams(
            dimension_semantics=("parallel",),
        ),
    )(x, h, a, wi, wh, bi, bh)

    return out[:B]


def reference_forward(inputs, hx, att_score, params):
    """Pure-JAX reference of AUGRUCell.forward."""
    w_ih, w_hh, b_ih, b_hh = params
    H = hx.shape[1]
    gi = inputs @ w_ih.T + b_ih
    gh = hx @ w_hh.T + b_hh
    i_r, i_z, i_n = gi[:, :H], gi[:, H:2 * H], gi[:, 2 * H:]
    h_r, h_z, h_n = gh[:, :H], gh[:, H:2 * H], gh[:, 2 * H:]
    r = jax.nn.sigmoid(i_r + h_r)
    z = jax.nn.sigmoid(i_z + h_z)
    n = jnp.tanh(i_n + r * h_n)
    az = att_score.reshape(-1, 1) * z
    return (1.0 - az) * hx + az * n


if __name__ == "__main__":
    B, D, H = 256, 16, 32        # batch, input_size, hidden_size
    key = jax.random.PRNGKey(0)
    k1, k2, k3, k4, k5, k6, k7 = jax.random.split(key, 7)

    inputs = jax.random.normal(k1, (B, D), jnp.float32)
    hx = jax.random.normal(k2, (B, H), jnp.float32)
    att_score = jax.random.uniform(k3, (B,), jnp.float32)
    # Note: the PyTorch module leaves weight_ih/weight_hh uninitialized and
    # zeros the biases; use deterministic random values so the gates are
    # exercised numerically.
    w_ih = jax.random.normal(k4, (3 * H, D), jnp.float32) * 0.1
    w_hh = jax.random.normal(k5, (3 * H, H), jnp.float32) * 0.1
    b_ih = jax.random.normal(k6, (3 * H,), jnp.float32) * 0.1
    b_hh = jax.random.normal(k7, (3 * H,), jnp.float32) * 0.1

    hy = augru_cell(inputs, hx, att_score, w_ih, w_hh, b_ih, b_hh, tile_rows=128)
    hy = jax.block_until_ready(hy)

    ref = reference_forward(inputs, hx, att_score, (w_ih, w_hh, b_ih, b_hh))
    assert hy.shape == (B, H)
    assert jnp.allclose(hy, ref, atol=1e-5, rtol=1e-5), "mismatch vs reference"

    print("KERNEL_OK")
</pallas_src>

<mosaic_0001>
module attributes {stable_mosaic.version = 11 : i64} {
  func.func @augru_kernel(%arg0: i32, %arg1: memref<128x16xf32, #tpu.memory_space<vmem>>, %arg2: memref<128x32xf32, #tpu.memory_space<vmem>>, %arg3: memref<128x1xf32, #tpu.memory_space<vmem>>, %arg4: memref<3x16x32xf32, #tpu.memory_space<vmem>>, %arg5: memref<3x32x32xf32, #tpu.memory_space<vmem>>, %arg6: memref<3x1x32xf32, #tpu.memory_space<vmem>>, %arg7: memref<3x1x32xf32, #tpu.memory_space<vmem>>, %arg8: memref<128x32xf32, #tpu.memory_space<vmem>>) attributes {dimension_semantics = [#tpu.dimension_semantics<parallel>], iteration_bounds = array<i64: 2>, scalar_prefetch = 0 : i64, scratch_operands = 0 : i64, tpu.core_type = #tpu.core_type<tc>, window_params = [{transform_indices = @transform_0, window_bounds = array<i64: 128, 16>}, {transform_indices = @transform_1, window_bounds = array<i64: 128, 32>}, {transform_indices = @transform_2, window_bounds = array<i64: 128, 1>}, {pipeline_mode = #tpu.pipeline_mode<synchronous>, transform_indices = @transform_3, window_bounds = array<i64: 3, 16, 32>}, {pipeline_mode = #tpu.pipeline_mode<synchronous>, transform_indices = @transform_4, window_bounds = array<i64: 3, 32, 32>}, {pipeline_mode = #tpu.pipeline_mode<synchronous>, transform_indices = @transform_5, window_bounds = array<i64: 3, 1, 32>}, {pipeline_mode = #tpu.pipeline_mode<synchronous>, transform_indices = @transform_6, window_bounds = array<i64: 3, 1, 32>}, {transform_indices = @transform_7, window_bounds = array<i64: 128, 32>}]} {
    %c0 = arith.constant 0 : index
    %c0_0 = arith.constant 0 : index
    %0 = vector.load %arg1[%c0, %c0_0] : memref<128x16xf32, #tpu.memory_space<vmem>>, vector<128x16xf32>
    %c0_1 = arith.constant 0 : index
    %c0_2 = arith.constant 0 : index
    %1 = vector.load %arg2[%c0_1, %c0_2] : memref<128x32xf32, #tpu.memory_space<vmem>>, vector<128x32xf32>
    %c0_3 = arith.constant 0 : index
    %c0_4 = arith.constant 0 : index
    %2 = vector.load %arg3[%c0_3, %c0_4] : memref<128x1xf32, #tpu.memory_space<vmem>>, vector<128x1xf32>
    %c0_5 = arith.constant 0 : index
    %c0_6 = arith.constant 0 : index
    %c0_7 = arith.constant 0 : index
    %3 = vector.load %arg4[%c0_5, %c0_6, %c0_7] : memref<3x16x32xf32, #tpu.memory_space<vmem>>, vector<1x16x32xf32>
    %4 = vector.shape_cast %3 : vector<1x16x32xf32> to vector<16x32xf32>
    %cst = arith.constant dense<0.000000e+00> : vector<128x32xf32>
    %5 = tpu.matmul %0, %4, %cst {dimension_numbers = #tpu.dot_dimension_numbers<[1], [0], [0], [1], [0, 0, 1, 1], [], []>} : vector<128x16xf32>, vector<16x32xf32>, vector<128x32xf32> -> vector<128x32xf32>
    %c0_8 = arith.constant 0 : index
    %c0_9 = arith.constant 0 : index
    %c0_10 = arith.constant 0 : index
    %6 = vector.load %arg6[%c0_8, %c0_9, %c0_10] : memref<3x1x32xf32, #tpu.memory_space<vmem>>, vector<1x1x32xf32>
    %7 = vector.shape_cast %6 : vector<1x1x32xf32> to vector<1x32xf32>
    %8 = vector.broadcast %7 : vector<1x32xf32> to vector<128x32xf32>
    %9 = arith.addf %5, %8 : vector<128x32xf32>
    %c0_11 = arith.constant 0 : index
    %c0_12 = arith.constant 0 : index
    %c0_13 = arith.constant 0 : index
    %10 = vector.load %arg5[%c0_11, %c0_12, %c0_13] : memref<3x32x32xf32, #tpu.memory_space<vmem>>, vector<1x32x32xf32>
    %11 = vector.shape_cast %10 : vector<1x32x32xf32> to vector<32x32xf32>
    %cst_14 = arith.constant dense<0.000000e+00> : vector<128x32xf32>
    %12 = tpu.matmul %1, %11, %cst_14 {dimension_numbers = #tpu.dot_dimension_numbers<[1], [0], [0], [1], [0, 0, 1, 1], [], []>} : vector<128x32xf32>, vector<32x32xf32>, vector<128x32xf32> -> vector<128x32xf32>
    %c0_15 = arith.constant 0 : index
    %c0_16 = arith.constant 0 : index
    %c0_17 = arith.constant 0 : index
    %13 = vector.load %arg7[%c0_15, %c0_16, %c0_17] : memref<3x1x32xf32, #tpu.memory_space<vmem>>, vector<1x1x32xf32>
    %14 = vector.shape_cast %13 : vector<1x1x32xf32> to vector<1x32xf32>
    %15 = vector.broadcast %14 : vector<1x32xf32> to vector<128x32xf32>
    %16 = arith.addf %12, %15 : vector<128x32xf32>
    %17 = arith.addf %9, %16 : vector<128x32xf32>
    %18 = arith.negf %17 : vector<128x32xf32>
    %19 = math.exp %18 : vector<128x32xf32>
    %cst_18 = arith.constant 1.000000e+00 : f32
    %20 = vector.broadcast %cst_18 : f32 to vector<128x32xf32>
    %21 = arith.addf %20, %19 : vector<128x32xf32>
    %22 = arith.divf %20, %21 : vector<128x32xf32>
    %c1 = arith.constant 1 : index
    %c0_19 = arith.constant 0 : index
    %c0_20 = arith.constant 0 : index
    %23 = vector.load %arg4[%c1, %c0_19, %c0_20] : memref<3x16x32xf32, #tpu.memory_space<vmem>>, vector<1x16x32xf32>
    %24 = vector.shape_cast %23 : vector<1x16x32xf32> to vector<16x32xf32>
    %cst_21 = arith.constant dense<0.000000e+00> : vector<128x32xf32>
    %25 = tpu.matmul %0, %24, %cst_21 {dimension_numbers = #tpu.dot_dimension_numbers<[1], [0], [0], [1], [0, 0, 1, 1], [], []>} : vector<128x16xf32>, vector<16x32xf32>, vector<128x32xf32> -> vector<128x32xf32>
    %c1_22 = arith.constant 1 : index
    %c0_23 = arith.constant 0 : index
    %c0_24 = arith.constant 0 : index
    %26 = vector.load %arg6[%c1_22, %c0_23, %c0_24] : memref<3x1x32xf32, #tpu.memory_space<vmem>>, vector<1x1x32xf32>
    %27 = vector.shape_cast %26 : vector<1x1x32xf32> to vector<1x32xf32>
    %28 = vector.broadcast %27 : vector<1x32xf32> to vector<128x32xf32>
    %29 = arith.addf %25, %28 : vector<128x32xf32>
    %c1_25 = arith.constant 1 : index
    %c0_26 = arith.constant 0 : index
    %c0_27 = arith.constant 0 : index
    %30 = vector.load %arg5[%c1_25, %c0_26, %c0_27] : memref<3x32x32xf32, #tpu.memory_space<vmem>>, vector<1x32x32xf32>
    %31 = vector.shape_cast %30 : vector<1x32x32xf32> to vector<32x32xf32>
    %cst_28 = arith.constant dense<0.000000e+00> : vector<128x32xf32>
    %32 = tpu.matmul %1, %31, %cst_28 {dimension_numbers = #tpu.dot_dimension_numbers<[1], [0], [0], [1], [0, 0, 1, 1], [], []>} : vector<128x32xf32>, vector<32x32xf32>, vector<128x32xf32> -> vector<128x32xf32>
    %c1_29 = arith.constant 1 : index
    %c0_30 = arith.constant 0 : index
    %c0_31 = arith.constant 0 : index
    %33 = vector.load %arg7[%c1_29, %c0_30, %c0_31] : memref<3x1x32xf32, #tpu.memory_space<vmem>>, vector<1x1x32xf32>
    %34 = vector.shape_cast %33 : vector<1x1x32xf32> to vector<1x32xf32>
    %35 = vector.broadcast %34 : vector<1x32xf32> to vector<128x32xf32>
    %36 = arith.addf %32, %35 : vector<128x32xf32>
    %37 = arith.addf %29, %36 : vector<128x32xf32>
    %38 = arith.negf %37 : vector<128x32xf32>
    %39 = math.exp %38 : vector<128x32xf32>
    %cst_32 = arith.constant 1.000000e+00 : f32
    %40 = vector.broadcast %cst_32 : f32 to vector<128x32xf32>
    %41 = arith.addf %40, %39 : vector<128x32xf32>
    %42 = arith.divf %40, %41 : vector<128x32xf32>
    %c2 = arith.constant 2 : index
    %c0_33 = arith.constant 0 : index
    %c0_34 = arith.constant 0 : index
    %43 = vector.load %arg4[%c2, %c0_33, %c0_34] : memref<3x16x32xf32, #tpu.memory_space<vmem>>, vector<1x16x32xf32>
    %44 = vector.shape_cast %43 : vector<1x16x32xf32> to vector<16x32xf32>
    %cst_35 = arith.constant dense<0.000000e+00> : vector<128x32xf32>
    %45 = tpu.matmul %0, %44, %cst_35 {dimension_numbers = #tpu.dot_dimension_numbers<[1], [0], [0], [1], [0, 0, 1, 1], [], []>} : vector<128x16xf32>, vector<16x32xf32>, vector<128x32xf32> -> vector<128x32xf32>
    %c2_36 = arith.constant 2 : index
    %c0_37 = arith.constant 0 : index
    %c0_38 = arith.constant 0 : index
    %46 = vector.load %arg6[%c2_36, %c0_37, %c0_38] : memref<3x1x32xf32, #tpu.memory_space<vmem>>, vector<1x1x32xf32>
    %47 = vector.shape_cast %46 : vector<1x1x32xf32> to vector<1x32xf32>
    %48 = vector.broadcast %47 : vector<1x32xf32> to vector<128x32xf32>
    %49 = arith.addf %45, %48 : vector<128x32xf32>
    %c2_39 = arith.constant 2 : index
    %c0_40 = arith.constant 0 : index
    %c0_41 = arith.constant 0 : index
    %50 = vector.load %arg5[%c2_39, %c0_40, %c0_41] : memref<3x32x32xf32, #tpu.memory_space<vmem>>, vector<1x32x32xf32>
    %51 = vector.shape_cast %50 : vector<1x32x32xf32> to vector<32x32xf32>
    %cst_42 = arith.constant dense<0.000000e+00> : vector<128x32xf32>
    %52 = tpu.matmul %1, %51, %cst_42 {dimension_numbers = #tpu.dot_dimension_numbers<[1], [0], [0], [1], [0, 0, 1, 1], [], []>} : vector<128x32xf32>, vector<32x32xf32>, vector<128x32xf32> -> vector<128x32xf32>
    %c2_43 = arith.constant 2 : index
    %c0_44 = arith.constant 0 : index
    %c0_45 = arith.constant 0 : index
    %53 = vector.load %arg7[%c2_43, %c0_44, %c0_45] : memref<3x1x32xf32, #tpu.memory_space<vmem>>, vector<1x1x32xf32>
    %54 = vector.shape_cast %53 : vector<1x1x32xf32> to vector<1x32xf32>
    %55 = vector.broadcast %54 : vector<1x32xf32> to vector<128x32xf32>
    %56 = arith.addf %52, %55 : vector<128x32xf32>
    %57 = arith.mulf %22, %56 : vector<128x32xf32>
    %58 = arith.addf %49, %57 : vector<128x32xf32>
    %59 = math.tanh %58 : vector<128x32xf32>
    %60 = vector.broadcast %2 : vector<128x1xf32> to vector<128x32xf32>
    %61 = arith.mulf %60, %42 : vector<128x32xf32>
    %cst_46 = arith.constant 1.000000e+00 : f32
    %62 = vector.broadcast %cst_46 : f32 to vector<128x32xf32>
    %63 = arith.subf %62, %61 : vector<128x32xf32>
    %64 = arith.mulf %63, %1 : vector<128x32xf32>
    %65 = arith.mulf %61, %59 : vector<128x32xf32>
    %66 = arith.addf %64, %65 : vector<128x32xf32>
    %c0_47 = arith.constant 0 : index
    %c0_48 = arith.constant 0 : index
    %67 = vector.load %arg8[%c0_47, %c0_48] : memref<128x32xf32, #tpu.memory_space<vmem>>, vector<128x32xf32>
    tpu.vector_store %arg8[%c0_47, %c0_48], %66 {strides = array<i32>} : memref<128x32xf32, #tpu.memory_space<vmem>>, vector<128x32xf32>,
    return
  }
  func.func @transform_0(%arg0: i32) -> (i32, i32) {
    %c0_i32 = arith.constant 0 : i32
    %c0_i32_0 = arith.constant 0 : i32
    return %arg0, %c0_i32 : i32, i32
  }
  func.func @transform_1(%arg0: i32) -> (i32, i32) {
    %c0_i32 = arith.constant 0 : i32
    %c0_i32_0 = arith.constant 0 : i32
    return %arg0, %c0_i32 : i32, i32
  }
  func.func @transform_2(%arg0: i32) -> (i32, i32) {
    %c0_i32 = arith.constant 0 : i32
    %c0_i32_0 = arith.constant 0 : i32
    return %arg0, %c0_i32 : i32, i32
  }
  func.func @transform_3(%arg0: i32) -> (i32, i32, i32) {
    %c0_i32 = arith.constant 0 : i32
    %c0_i32_0 = arith.constant 0 : i32
    %c0_i32_1 = arith.constant 0 : i32
    %c0_i32_2 = arith.constant 0 : i32
    return %c0_i32, %c0_i32_0, %c0_i32_1 : i32, i32, i32
  }
  func.func @transform_4(%arg0: i32) -> (i32, i32, i32) {
    %c0_i32 = arith.constant 0 : i32
    %c0_i32_0 = arith.constant 0 : i32
    %c0_i32_1 = arith.constant 0 : i32
    %c0_i32_2 = arith.constant 0 : i32
    return %c0_i32, %c0_i32_0, %c0_i32_1 : i32, i32, i32
  }
  func.func @transform_5(%arg0: i32) -> (i32, i32, i32) {
    %c0_i32 = arith.constant 0 : i32
    %c0_i32_0 = arith.constant 0 : i32
    %c0_i32_1 = arith.constant 0 : i32
    %c0_i32_2 = arith.constant 0 : i32
    return %c0_i32, %c0_i32_0, %c0_i32_1 : i32, i32, i32
  }
  func.func @transform_6(%arg0: i32) -> (i32, i32, i32) {
    %c0_i32 = arith.constant 0 : i32
    %c0_i32_0 = arith.constant 0 : i32
    %c0_i32_1 = arith.constant 0 : i32
    %c0_i32_2 = arith.constant 0 : i32
    return %c0_i32, %c0_i32_0, %c0_i32_1 : i32, i32, i32
  }
  func.func @transform_7(%arg0: i32) -> (i32, i32) {
    %c0_i32 = arith.constant 0 : i32
    %c0_i32_0 = arith.constant 0 : i32
    return %arg0, %c0_i32 : i32, i32
  }
}

</mosaic_0001>

<bundles_post_ra>
// kernel: augru_cell.1
= control target key start
LH: loop header
LB: loop body
LE: loop exit
PB: predicated region body
PF: predicated region fallthrough
CT: control target
= control target key end

     0   :  { %s2758_s24 = smov 0   ;;  %s3420_s0 = inlined_call_operand.vmem [shape: f32[256,16], index: 0, kind: input, shape index: {}]   ;;  %s3421_s1 = inlined_call_operand.vmem [shape: f32[256,32], index: 1, kind: input, shape index: {}]   ;;  %s3422_s2 = inlined_call_operand.vmem [shape: f32[256,1], index: 2, kind: input, shape index: {}]   ;;  %s3423_s3 = inlined_call_operand.vmem [shape: f32[3,16,32], index: 3, kind: input, shape index: {}]   ;;  %s3424_s4 = inlined_call_operand.vmem [shape: f32[3,32,32], index: 4, kind: input, shape index: {}]   ;;  %s3425_s5 = inlined_call_operand.vmem [shape: f32[3,1,32], index: 5, kind: input, shape index: {}]   ;;  %s3426_s6 = inlined_call_operand.vmem [shape: f32[3,1,32], index: 6, kind: input, shape index: {}]   ;;  %s3427_s7 = inlined_call_operand.vmem [shape: f32[256,32], index: 7, kind: output, shape index: {}]  }
   0x1 LB: > { %s1938_s25 = sadd.s32 4294967295, %s2715_s24   ;;  %p1942_p0 = scmp.ge.s32.totalorder %s2715_s24, 1  ;;  %s2715_s24 = sphi %s2758_s24, %s17_s24  }
   0x2   : > { %p260_p1 = scmp.lt.s32.totalorder %s2715_s24, 3 }
   0x4   : > { %p261_p2 = pnand %p1942_p0, %p260_p1 }
   0x5   : > { %v2001_v0 = vld [vmem:[%s3423_s3 + $0x10] sm:$0xff] (!%p261_p2)  ;;  %v2002_v1 = vld [vmem:[%s3423_s3 + $0x18] sm:$0xff] (!%p261_p2)  ;;  %v374_v2 = vld [vmem:[%s3423_s3] sm:$0xff] (!%p261_p2)  ;;  %s1943_s9 = sshll.u32 (!%p261_p2), %s1938_s25, 4  ;;  %v2717_v11 = vmov (!%p261_p2), 0   ;;  %vm383_vm0 = vcmask (!%p261_p2), 130048  }
   0x6   : > { %264 = sbr.rel (%p261_p2) target bundleno = 372 (0x174), region = 48  ;;  %v2409_v3 = vpack.c.bf16 (!%p261_p2), %v2002_v1, %v2001_v0  ;;  %v375_v4 = vld [vmem:[%s3423_s3 + $0x8] sm:$0xff] (!%p261_p2)  ;;  %p303_p3 = scmp.lt.s32.totalorder (!%p261_p2), %s1943_s9, 31  ;;  %v2021_v5 = vld [vmem:[%s3424_s4 + $0x20] sm:$0xff] (!%p261_p2)  ;;  %2539 = vset.pattern.permute.xlu1 (!%p261_p2), %v2717_v11  ;;  %2538 = vset.pattern.permute.xlu0 (!%p261_p2), %v2717_v11  ;;  %v2023_v13 = vld [vmem:[%s3424_s4 + $0x30] sm:$0xff] (!%p261_p2)  ;;  %vm588_vm1 = vcmask (!%p261_p2), 261120  }
   0x7   : > { %v2022_v6 = vld [vmem:[%s3424_s4 + $0x28] sm:$0xff] (!%p261_p2)  ;;  %v2397_v7 = vpack.c.bf16 (!%p261_p2), %v375_v4, %v374_v2  ;;  %v577_v9 = vld [vmem:[%s3424_s4] sm:$0xff] (!%p261_p2)  ;;  %v2024_v14 = vld [vmem:[%s3424_s4 + $0x38] sm:$0xff] (!%p261_p2) }
   0x8   : > { %v2413_v8 = vpack.c.bf16 (!%p261_p2), %v2022_v6, %v2021_v5  ;;  %v578_v10 = vld [vmem:[%s3424_s4 + $0x8] sm:$0xff] (!%p261_p2)  ;;  %2410 = vmatprep.subr.bf16.mxu1 (!%p261_p2), %v2409_v3  ;;  %v579_v15 = vld [vmem:[%s3424_s4 + $0x10] sm:$0xff] (!%p261_p2)  ;;  %v580_v16 = vld [vmem:[%s3424_s4 + $0x18] sm:$0xff] (!%p261_p2)  ;;  %v2417_v20 = vpack.c.bf16 (!%p261_p2), %v2024_v14, %v2023_v13 }
   0x9   : > { %v2401_v12 = vpack.c.bf16 (!%p261_p2), %v578_v10, %v577_v9  ;;  %2398 = vmatprep.subr.bf16.mxu0 (!%p261_p2), %v2397_v7  ;;  %2412 = vmatpush3.bf16.msra.mxu1 (!%p261_p2), %v2409_v3  ;;  %v2405_v21 = vpack.c.bf16 (!%p261_p2), %v580_v16, %v579_v15  ;;  %v2079_v22 = vld [vmem:[%s3424_s4 + $0x40] sm:$0xff] (!%p261_p2)  ;;  %v2080_v23 = vld [vmem:[%s3424_s4 + $0x48] sm:$0xff] (!%p261_p2)  ;;  %v2081_v54 = vld [vmem:[%s3424_s4 + $0x50] sm:$0xff] (!%p261_p2) }
   0xa   : > { %2400 = vmatpush3.bf16.msra.mxu0 (!%p261_p2), %v2397_v7  ;;  %2414 = vmatprep.subr.bf16.mxu1 (!%p261_p2), %v2413_v8  ;;  %v2059_v24 = vld [vmem:[%s3423_s3 + $0x20] sm:$0xff] (!%p261_p2)  ;;  %v2060_v25 = vld [vmem:[%s3423_s3 + $0x28] sm:$0xff] (!%p261_p2)  ;;  %v2849_v28 = vpack.c.bf16 (!%p261_p2), %v2080_v23, %v2079_v22  ;;  %v2082_v55 = vld [vmem:[%s3424_s4 + $0x58] sm:$0xff] (!%p261_p2) }
   0xb   : > { %2402 = vmatprep.subr.bf16.mxu0 (!%p261_p2), %v2401_v12  ;;  %v2851_v29 = vpack.c.bf16 (!%p261_p2), %v2060_v25, %v2059_v24  ;;  %v2429_v58 = vpack.c.bf16 (!%p261_p2), %v2082_v55, %v2081_v54  ;;  %v1968_v13 = vld [vmem:[%s3426_s6] ss:$0 sm:$0xff] (!%p261_p2)  ;;  %v2004_v14 = vld [vmem:[%s3425_s5 + $0x1] ss:$0 sm:$0xff] (!%p261_p2) }
   0xc   : > { %v2026_v15 = vld [vmem:[%s3426_s6 + $0x1] ss:$0 sm:$0xff] (!%p261_p2) }
   0xd   : > { %s3429_s9 = smov (!%p303_p3, %s1943_s9), 31 }
   0xe   : > { %s2793_s22 = sshll.u32 %s3429_s9, 3 }
   0xf   : > { %s2808_s9 = scalar_lea.vmem %s3420_s0, %s2793_s22  ;;  %s2868_s20 = scalar_lea.vmem %s3422_s2, %s2793_s22 }
  0x10   : > { %v2811_v17 = vld [vmem:[%s2808_s9] sm:$0xff]  ;;  %v2814_v18 = vld [vmem:[%s2808_s9 + $0x8] sm:$0xff]  ;;  %v2821_v19 = vld [vmem:[%s2808_s9 + $0x10] sm:$0xff]  ;;  %s2943_s25 = scalar_lea.vmem %s3421_s1, %s2793_s22  ;;  %s3337_s21 = scalar_lea.vmem %s3427_s7, %s2793_s22 }
  0x11   : > { %2221 = vmatprep.mubr.msk.f32.mxu0 %vm383_vm0, %v2811_v17  ;;  %2281 = vmatprep.mubr.msk.f32.mxu1 %vm383_vm0, %v2811_v17  ;;  %v2840_v26 = vld [vmem:[%s2808_s9 + $0x18] sm:$0xff]  ;;  %v2847_v27 = vld [vmem:[%s2808_s9 + $0x20] sm:$0xff]  ;;  %v2862_v30 = vld [vmem:[%s2808_s9 + $0x28] sm:$0xff] }
  0x12   : > { %2222 = vmatmul.mubr.msk.f32.vlgmr.msra.gmra.mrb[0].mxu0 %vm383_vm0, %v2814_v18  ;;  %2282 = vmatmul.mubr.msk.f32.vlgmr.msra.gmra.mrb[0].mxu1 %vm383_vm0, %v2814_v18  ;;  %v2871_v31 = vld [vmem:[%s2808_s9 + $0x30] sm:$0xff]  ;;  %v2885_v33 = vld [vmem:[%s2808_s9 + $0x38] sm:$0xff]  ;;  %v358_v34 = vld [vmem:[%s2868_s20] sm:$0xff] }
  0x13   : > { %2416 = vmatpush3.bf16.msra.mxu1 %v2413_v8  ;;  %2404 = vmatpush3.bf16.msra.mxu0 %v2401_v12  ;;  %v360_v32 = vld [vmem:[%s2868_s20 + $0x10] sm:$0xff]  ;;  %v2889_v35 = vld [vmem:[%s2808_s9 + $0x40] sm:$0xff]  ;;  %v361_v36 = vld [vmem:[%s2868_s20 + $0x18] sm:$0xff] }
  0x14   : > { %2224 = vmatprep.mubr.msk.f32.mxu0 %vm383_vm0, %v2821_v19  ;;  %2284 = vmatprep.mubr.msk.f32.mxu1 %vm383_vm0, %v2821_v19  ;;  %v359_v37 = vld [vmem:[%s2868_s20 + $0x8] sm:$0xff]  ;;  %v2905_v39 = vld [vmem:[%s2808_s9 + $0x50] sm:$0xff]  ;;  %v362_v41 = vld [vmem:[%s2868_s20 + $0x20] sm:$0xff] }
  0x15   : > { %2418 = vmatprep.subr.bf16.mxu1 %v2417_v20  ;;  %2406 = vmatprep.subr.bf16.mxu0 %v2405_v21  ;;  %v2902_v38 = vld [vmem:[%s2808_s9 + $0x48] sm:$0xff]  ;;  %v2918_v42 = vld [vmem:[%s2808_s9 + $0x58] sm:$0xff]  ;;  %v2921_v43 = vld [vmem:[%s2808_s9 + $0x60] sm:$0xff] }
  0x16   : > { %2225 = vmatmul.mubr.msk.f32.gmra.mrb[2].mxu0 %vm383_vm0, %v2840_v26  ;;  %2285 = vmatmul.mubr.msk.f32.gmra.mrb[2].mxu1 %vm383_vm0, %v2840_v26  ;;  %v363_v40 = vld [vmem:[%s2868_s20 + $0x28] sm:$0xff]  ;;  %v365_v44 = vld [vmem:[%s2868_s20 + $0x38] sm:$0xff]  ;;  %v364_v45 = vld [vmem:[%s2868_s20 + $0x30] sm:$0xff] }
  0x17   : > { %2227 = vmatprep.mubr.msk.f32.mxu0 %vm383_vm0, %v2847_v27  ;;  %2287 = vmatprep.mubr.msk.f32.mxu1 %vm383_vm0, %v2847_v27  ;;  %v2934_v46 = vld [vmem:[%s2808_s9 + $0x68] sm:$0xff]  ;;  %v2937_v47 = vld [vmem:[%s2808_s9 + $0x70] sm:$0xff]  ;;  %v366_v49 = vld [vmem:[%s2868_s20 + $0x40] sm:$0xff] }
  0x18   : > { %2420 = vmatpush3.bf16.msra.mxu1 %v2417_v20  ;;  %2408 = vmatpush3.bf16.msra.mxu0 %v2405_v21  ;;  %v367_v48 = vld [vmem:[%s2868_s20 + $0x48] sm:$0xff]  ;;  %v2956_v50 = vld [vmem:[%s2808_s9 + $0x78] sm:$0xff]  ;;  %v2959_v51 = vld [vmem:[%s2943_s25] sm:$0xff]  ;;  %v3121_v21 = vadd.f32 %v2026_v15, %v2004_v14 }
  0x19   : > { %2426 = vmatprep.subr.bf16.mxu1 %v2849_v28  ;;  %2422 = vmatprep.subr.bf16.mxu0 %v2851_v29  ;;  %v369_v52 = vld [vmem:[%s2868_s20 + $0x58] sm:$0xff]  ;;  %v368_v53 = vld [vmem:[%s2868_s20 + $0x50] sm:$0xff]  ;;  %v2978_v56 = vld [vmem:[%s2943_s25 + $0x8] sm:$0xff] }
  0x1a   : > { %2228 = vmatmul.mubr.msk.f32.gmra.mrb[4].mxu0 %vm383_vm0, %v2862_v30  ;;  %2288 = vmatmul.mubr.msk.f32.gmra.mrb[4].mxu1 %vm383_vm0, %v2862_v30  ;;  %v2981_v57 = vld [vmem:[%s2943_s25 + $0x10] sm:$0xff]  ;;  %v371_v59 = vld [vmem:[%s2868_s20 + $0x68] sm:$0xff]  ;;  %v2991_v60 = vld [vmem:[%s2943_s25 + $0x18] sm:$0xff] }
  0x1b   : > { %2230 = vmatprep.mubr.msk.f32.mxu0 %vm383_vm0, %v2871_v31  ;;  %2290 = vmatprep.mubr.msk.f32.mxu1 %vm383_vm0, %v2871_v31  ;;  %v2998_v61 = vld [vmem:[%s2943_s25 + $0x20] sm:$0xff]  ;;  %v373_v63 = vld [vmem:[%s2868_s20 + $0x78] sm:$0xff]  ;;  %v3011_v0 = vld [vmem:[%s2943_s25 + $0x28] sm:$0xff] }
  0x1c   : > { %1694 = vperm.xlu1 %2539, %v360_v32   ;;  %1684 = vperm.xlu0 %2538, %v358_v34   ;;  %v370_v62 = vld [vmem:[%s2868_s20 + $0x60] sm:$0xff]  ;;  %v348_v1 = vld [vmem:[%s2943_s25 + $0x30] sm:$0xff]  ;;  %v3022_v3 = vld [vmem:[%s2943_s25 + $0x38] sm:$0xff] }
  0x1d   : > { %v372_v2 = vld [vmem:[%s2868_s20 + $0x70] sm:$0xff]  ;;  %v350_v4 = vld [vmem:[%s2943_s25 + $0x40] sm:$0xff]  ;;  %v351_v5 = vld [vmem:[%s2943_s25 + $0x48] sm:$0xff] }
  0x1e   : > { %2231 = vmatmul.mubr.msk.f32.gmra.mrb[6].mxu0 %vm383_vm0, %v2885_v33  ;;  %2291 = vmatmul.mubr.msk.f32.gmra.mrb[6].mxu1 %vm383_vm0, %v2885_v33  ;;  %v352_v6 = vld [vmem:[%s2943_s25 + $0x50] sm:$0xff]  ;;  %v353_v7 = vld [vmem:[%s2943_s25 + $0x58] sm:$0xff]  ;;  %v354_v8 = vld [vmem:[%s2943_s25 + $0x60] sm:$0xff] }
  0x1f   : > { %2233 = vmatprep.mubr.msk.f32.mxu0 %vm383_vm0, %v2889_v35  ;;  %2293 = vmatprep.mubr.msk.f32.mxu1 %vm383_vm0, %v2889_v35  ;;  %v355_v9 = vld [vmem:[%s2943_s25 + $0x68] sm:$0xff]  ;;  %v356_v10 = vld [vmem:[%s2943_s25 + $0x70] sm:$0xff]  ;;  %v357_v11 = vld [vmem:[%s2943_s25 + $0x78] sm:$0xff] }
  0x20   : > { %1699 = vperm.xlu1 %2539, %v361_v36   ;;  %1689 = vperm.xlu0 %2538, %v359_v37   ;;  %v1951_v12 = vld [vmem:[%s3425_s5] ss:$0 sm:$0xff] }
  0x22   : > { %2234 = vmatmul.mubr.msk.f32.gmra.mrb[8].mxu0 %vm383_vm0, %v2902_v38  ;;  %2294 = vmatmul.mubr.msk.f32.gmra.mrb[8].mxu1 %vm383_vm0, %v2902_v38 }
  0x23   : > { %2236 = vmatprep.mubr.msk.f32.mxu0 %vm383_vm0, %v2905_v39  ;;  %2296 = vmatprep.mubr.msk.f32.mxu1 %vm383_vm0, %v2905_v39 }
  0x24   : > { %1709 = vperm.xlu1 %2539, %v363_v40   ;;  %1704 = vperm.xlu0 %2538, %v362_v41  }
  0x26   : > { %2237 = vmatmul.mubr.msk.f32.gmra.mrb[10].mxu0 %vm383_vm0, %v2918_v42  ;;  %2297 = vmatmul.mubr.msk.f32.gmra.mrb[10].mxu1 %vm383_vm0, %v2918_v42 }
  0x27   : > { %2239 = vmatprep.mubr.msk.f32.mxu0 %vm383_vm0, %v2921_v43  ;;  %2299 = vmatprep.mubr.msk.f32.mxu1 %vm383_vm0, %v2921_v43 }
  0x28   : > { %1719 = vperm.xlu1 %2539, %v365_v44   ;;  %1714 = vperm.xlu0 %2538, %v364_v45  }
  0x2a   : > { %2240 = vmatmul.mubr.msk.f32.gmra.mrb[12].mxu0 %vm383_vm0, %v2934_v46  ;;  %2300 = vmatmul.mubr.msk.f32.gmra.mrb[12].mxu1 %vm383_vm0, %v2934_v46 }
  0x2b   : > { %2242 = vmatprep.mubr.msk.f32.mxu0 %vm383_vm0, %v2937_v47  ;;  %2302 = vmatprep.mubr.msk.f32.mxu1 %vm383_vm0, %v2937_v47 }
  0x2c   : > { %1729 = vperm.xlu1 %2539, %v367_v48   ;;  %1724 = vperm.xlu0 %2538, %v366_v49  }
  0x2e   : > { %2243 = vmatmul.mubr.msk.f32.gmra.mrb[14].mxu0 %vm383_vm0, %v2956_v50  ;;  %2303 = vmatmul.mubr.msk.f32.gmra.mrb[14].mxu1 %vm383_vm0, %v2956_v50 }
  0x2f   : > { %2253 = vmatprep.mubr.msk.f32.mxu0 %vm588_vm1, %v2959_v51  ;;  %2313 = vmatprep.mubr.msk.f32.mxu1 %vm588_vm1, %v2959_v51 }
  0x30   : > { %1739 = vperm.xlu1 %2539, %v369_v52   ;;  %1734 = vperm.xlu0 %2538, %v368_v53  }
  0x32   : > { %2254 = vmatmul.mubr.msk.f32.vlgmr.msra.gmra.mrb[0].mxu0 %vm588_vm1, %v2978_v56  ;;  %2314 = vmatmul.mubr.msk.f32.vlgmr.msra.gmra.mrb[0].mxu1 %vm588_vm1, %v2978_v56 }
  0x33   : > { %2428 = vmatpush3.bf16.msra.mxu1 %v2849_v28  ;;  %2424 = vmatpush3.bf16.msra.mxu0 %v2851_v29 }
  0x34   : > { %2256 = vmatprep.mubr.msk.f32.mxu0 %vm588_vm1, %v2981_v57  ;;  %2316 = vmatprep.mubr.msk.f32.mxu1 %vm588_vm1, %v2981_v57 }
  0x35   : > { %2430 = vmatprep.subr.bf16.mxu1 %v2429_v58  ;;  %1749 = vperm.xlu1 %2539, %v371_v59  }
  0x36   : > { %2257 = vmatmul.mubr.msk.f32.gmra.mrb[2].mxu0 %vm588_vm1, %v2991_v60  ;;  %2317 = vmatmul.mubr.msk.f32.gmra.mrb[2].mxu1 %vm588_vm1, %v2991_v60 }
  0x37   : > { %2259 = vmatprep.mubr.msk.f32.mxu0 %vm588_vm1, %v2998_v61  ;;  %2319 = vmatprep.mubr.msk.f32.mxu1 %vm588_vm1, %v2998_v61 }
  0x38   : > { %2432 = vmatpush3.bf16.msra.mxu1 %v2429_v58  ;;  %1744 = vperm.xlu0 %2538, %v370_v62  }
  0x39   : > { %1759 = vperm.xlu1 %2539, %v373_v63  }
  0x3a   : > { %2260 = vmatmul.mubr.msk.f32.gmra.mrb[4].mxu0 %vm588_vm1, %v3011_v0  ;;  %2320 = vmatmul.mubr.msk.f32.gmra.mrb[4].mxu1 %vm588_vm1, %v3011_v0 }
  0x3b   : > { %2262 = vmatprep.mubr.msk.f32.mxu0 %vm588_vm1, %v348_v1  ;;  %2322 = vmatprep.mubr.msk.f32.mxu1 %vm588_vm1, %v348_v1 }
  0x3c   : > { %1754 = vperm.xlu0 %2538, %v372_v2  }
  0x3e   : > { %2263 = vmatmul.mubr.msk.f32.gmra.mrb[6].mxu0 %vm588_vm1, %v3022_v3  ;;  %2323 = vmatmul.mubr.msk.f32.gmra.mrb[6].mxu1 %vm588_vm1, %v3022_v3 }
  0x3f   : > { %2265 = vmatprep.mubr.msk.f32.mxu0 %vm588_vm1, %v350_v4  ;;  %2325 = vmatprep.mubr.msk.f32.mxu1 %vm588_vm1, %v350_v4 }
  0x42   : > { %2266 = vmatmul.mubr.msk.f32.gmra.mrb[8].mxu0 %vm588_vm1, %v351_v5  ;;  %2326 = vmatmul.mubr.msk.f32.gmra.mrb[8].mxu1 %vm588_vm1, %v351_v5 }
  0x43   : > { %2268 = vmatprep.mubr.msk.f32.mxu0 %vm588_vm1, %v352_v6  ;;  %2328 = vmatprep.mubr.msk.f32.mxu1 %vm588_vm1, %v352_v6 }
  0x46   : > { %2269 = vmatmul.mubr.msk.f32.gmra.mrb[10].mxu0 %vm588_vm1, %v353_v7  ;;  %2329 = vmatmul.mubr.msk.f32.gmra.mrb[10].mxu1 %vm588_vm1, %v353_v7 }
  0x47   : > { %2271 = vmatprep.mubr.msk.f32.mxu0 %vm588_vm1, %v354_v8  ;;  %2331 = vmatprep.mubr.msk.f32.mxu1 %vm588_vm1, %v354_v8 }
  0x4a   : > { %2272 = vmatmul.mubr.msk.f32.gmra.mrb[12].mxu0 %vm588_vm1, %v355_v9  ;;  %2332 = vmatmul.mubr.msk.f32.gmra.mrb[12].mxu1 %vm588_vm1, %v355_v9 }
  0x4b   : > { %2274 = vmatprep.mubr.msk.f32.mxu0 %vm588_vm1, %v356_v10  ;;  %2334 = vmatprep.mubr.msk.f32.mxu1 %vm588_vm1, %v356_v10 }
  0x4e   : > { %2275 = vmatmul.mubr.msk.f32.gmra.mrb[14].mxu0 %vm588_vm1, %v357_v11  ;;  %2335 = vmatmul.mubr.msk.f32.gmra.mrb[14].mxu1 %vm588_vm1, %v357_v11 }
  0x4f   : > { %2373 = vmatprep.mubr.msk.f32.mxu1 %vm588_vm1, %v2959_v51  ;;  %2341 = vmatprep.mubr.msk.f32.mxu0 %vm383_vm0, %v2811_v17 }
  0x52   : > { %2374 = vmatmul.mubr.msk.f32.vlgmr.msra.gmra.mrb[16].mxu1 %vm588_vm1, %v2978_v56  ;;  %2342 = vmatmul.mubr.msk.f32.vlgmr.msra.gmra.mrb[16].mxu0 %vm383_vm0, %v2814_v18 }
  0x53   : > { %2376 = vmatprep.mubr.msk.f32.mxu1 %vm588_vm1, %v2981_v57  ;;  %2344 = vmatprep.mubr.msk.f32.mxu0 %vm383_vm0, %v2821_v19  ;;  %v3119_v19 = vadd.f32 %v1968_v13, %v1951_v12 }
  0x56   : > { %2377 = vmatmul.mubr.msk.f32.gmra.mrb[18].mxu1 %vm588_vm1, %v2991_v60  ;;  %2345 = vmatmul.mubr.msk.f32.gmra.mrb[18].mxu0 %vm383_vm0, %v2840_v26 }
  0x57   : > { %2379 = vmatprep.mubr.msk.f32.mxu1 %vm588_vm1, %v2998_v61  ;;  %2347 = vmatprep.mubr.msk.f32.mxu0 %vm383_vm0, %v2847_v27 }
  0x5a   : > { %2380 = vmatmul.mubr.msk.f32.gmra.mrb[20].mxu1 %vm588_vm1, %v3011_v0  ;;  %2348 = vmatmul.mubr.msk.f32.gmra.mrb[20].mxu0 %vm383_vm0, %v2862_v30 }
  0x5b   : > { %2382 = vmatprep.mubr.msk.f32.mxu1 %vm588_vm1, %v348_v1  ;;  %2350 = vmatprep.mubr.msk.f32.mxu0 %vm383_vm0, %v2871_v31 }
  0x5e   : > { %2383 = vmatmul.mubr.msk.f32.gmra.mrb[22].mxu1 %vm588_vm1, %v3022_v3  ;;  %2351 = vmatmul.mubr.msk.f32.gmra.mrb[22].mxu0 %vm383_vm0, %v2885_v33 }
  0x5f   : > { %2385 = vmatprep.mubr.msk.f32.mxu1 %vm588_vm1, %v350_v4  ;;  %2353 = vmatprep.mubr.msk.f32.mxu0 %vm383_vm0, %v2889_v35 }
  0x62   : > { %2386 = vmatmul.mubr.msk.f32.gmra.mrb[24].mxu1 %vm588_vm1, %v351_v5  ;;  %2354 = vmatmul.mubr.msk.f32.gmra.mrb[24].mxu0 %vm383_vm0, %v2902_v38 }
  0x63   : > { %2388 = vmatprep.mubr.msk.f32.mxu1 %vm588_vm1, %v352_v6  ;;  %2356 = vmatprep.mubr.msk.f32.mxu0 %vm383_vm0, %v2905_v39 }
  0x66   : > { %2389 = vmatmul.mubr.msk.f32.gmra.mrb[26].mxu1 %vm588_vm1, %v353_v7  ;;  %2357 = vmatmul.mubr.msk.f32.gmra.mrb[26].mxu0 %vm383_vm0, %v2918_v42 }
  0x67   : > { %2391 = vmatprep.mubr.msk.f32.mxu1 %vm588_vm1, %v354_v8  ;;  %2359 = vmatprep.mubr.msk.f32.mxu0 %vm383_vm0, %v2921_v43 }
  0x6a   : > { %2392 = vmatmul.mubr.msk.f32.gmra.mrb[28].mxu1 %vm588_vm1, %v355_v9  ;;  %2360 = vmatmul.mubr.msk.f32.gmra.mrb[28].mxu0 %vm383_vm0, %v2934_v46 }
  0x6b   : > { %2394 = vmatprep.mubr.msk.f32.mxu1 %vm588_vm1, %v356_v10  ;;  %2362 = vmatprep.mubr.msk.f32.mxu0 %vm383_vm0, %v2937_v47 }
  0x6e   : > { %2395 = vmatmul.mubr.msk.f32.gmra.mrb[30].mxu1 %vm588_vm1, %v357_v11  ;;  %2363 = vmatmul.mubr.msk.f32.gmra.mrb[30].mxu0 %vm383_vm0, %v2956_v50 }
 0x105   : > { %v2255_v16 = vpop.f32.mrb[0].mxu0  ;;  %v2315_v17 = vpop.f32.mrb[0].mxu1 }
 0x106   : > { %v2433_v18 = vadd.f32 %v2255_v16, %v1951_v12  ;;  %v2465_v20 = vadd.f32 %v2315_v17, %v2004_v14  ;;  %v703_v22 = vpop.f32.mrb[1].mxu0  ;;  %v1129_v23 = vpop.f32.mrb[1].mxu1 }
 0x107   : > { %v2435_v24 = vadd.f32 %v1951_v12, %v703_v22  ;;  %v2467_v25 = vadd.f32 %v2004_v14, %v1129_v23 }
 0x108   : > { %v2434_v26 = vadd.f32 %v2433_v18, %v1968_v13  ;;  %v2466_v27 = vadd.f32 %v2465_v20, %v2026_v15 }
 0x109   : > { %v2436_v28 = vadd.f32 %v2435_v24, %v1968_v13  ;;  %v2468_v29 = vadd.f32 %v2467_v25, %v2026_v15  ;;  %v2258_v30 = vpop.f32.mrb[2].mxu0  ;;  %v2318_v31 = vpop.f32.mrb[2].mxu1 }
 0x10a   : > { %v1986_v32 = vmul.f32 -1.442695, %v2434_v26  ;;  %v2044_v33 = vmul.f32 -1.442695, %v2466_v27  ;;  %v2438_v34 = vadd.f32 %v3119_v19, %v2258_v30  ;;  %v2470_v35 = vadd.f32 %v3121_v21, %v2318_v31  ;;  %v713_v36 = vpop.f32.mrb[3].mxu0  ;;  %v1139_v37 = vpop.f32.mrb[3].mxu1 }
 0x10b   : > { %v1985_v38 = vmul.f32 -1.442695, %v2436_v28  ;;  %v2043_v39 = vmul.f32 -1.442695, %v2468_v29  ;;  %v2440_v40 = vadd.f32 %v3119_v19, %v713_v36  ;;  %v2472_v41 = vadd.f32 %v3121_v21, %v1139_v37 }
 0x10c   : > { %2540 = vpow2.f32 %v1986_v32  ;;  %v1988_v42 = vmul.f32 -1.442695, %v2438_v34  ;;  %v2046_v43 = vmul.f32 -1.442695, %v2470_v35 }
 0x10d   : > { %2542 = vpow2.f32 %v2044_v33  ;;  %v2261_v44 = vpop.f32.mrb[4].mxu0  ;;  %v2321_v45 = vpop.f32.mrb[4].mxu1  ;;  %v1987_v46 = vmul.f32 -1.442695, %v2440_v40  ;;  %v2045_v52 = vmul.f32 -1.442695, %v2472_v41 }
 0x10e   : > { %2544 = vpow2.f32 %v1985_v38  ;;  %v2442_v47 = vadd.f32 %v3119_v19, %v2261_v44  ;;  %v2474_v48 = vadd.f32 %v3121_v21, %v2321_v45  ;;  %v723_v49 = vpop.f32.mrb[5].mxu0  ;;  %v1149_v50 = vpop.f32.mrb[5].mxu1 }
 0x10f   : > { %2546 = vpow2.f32 %v2043_v39  ;;  %v2444_v53 = vadd.f32 %v3119_v19, %v723_v49  ;;  %v2476_v54 = vadd.f32 %v3121_v21, %v1149_v50 }
 0x110   : > { %2548 = vpow2.f32 %v1988_v42  ;;  %v1990_v55 = vmul.f32 -1.442695, %v2442_v47  ;;  %v2048_v58 = vmul.f32 -1.442695, %v2474_v48 }
 0x111   : > { %2550 = vpow2.f32 %v2046_v43  ;;  %v2264_v59 = vpop.f32.mrb[6].mxu0  ;;  %v2324_v62 = vpop.f32.mrb[6].mxu1  ;;  %v1989_v63 = vmul.f32 -1.442695, %v2444_v53  ;;  %v2047_v5 = vmul.f32 -1.442695, %v2476_v54 }
 0x112   : > { %2552 = vpow2.f32 %v1987_v46  ;;  %v2446_v1 = vadd.f32 %v3119_v19, %v2264_v59  ;;  %v733_v2 = vpop.f32.mrb[7].mxu0  ;;  %v1159_v4 = vpop.f32.mrb[7].mxu1  ;;  %v2478_v35 = vadd.f32 %v3121_v21, %v2324_v62 }
 0x113   : > { %2554 = vpow2.f32 %v2045_v52  ;;  %v2448_v40 = vadd.f32 %v3119_v19, %v733_v2  ;;  %v2480_v44 = vadd.f32 %v3121_v21, %v1159_v4  ;;  %v3155_v52 = vld [vmem:[%s3426_s6 + $0x2] ss:$0 sm:$0xff] }
 0x114   : > { %2556 = vpow2.f32 %v1990_v55  ;;  %v1992_v6 = vmul.f32 -1.442695, %v2446_v1  ;;  %v2050_v55 = vmul.f32 -1.442695, %v2478_v35 }
 0x115   : > { %2558 = vpow2.f32 %v2048_v58  ;;  %v2267_v7 = vpop.f32.mrb[8].mxu0  ;;  %v2327_v8 = vpop.f32.mrb[8].mxu1  ;;  %v1991_v2 = vmul.f32 -1.442695, %v2448_v40 }
 0x116   : > { %v2541_v9 = vpop.eup %2540  ;;  %2560 = vpow2.f32 %v1989_v63  ;;  %v743_v10 = vpop.f32.mrb[9].mxu0  ;;  %v2450_v45 = vadd.f32 %v3119_v19, %v2267_v7  ;;  %v2482_v48 = vadd.f32 %v3121_v21, %v2327_v8  ;;  %v2049_v7 = vmul.f32 -1.442695, %v2480_v44 }
 0x117   : > { %v1169_v11 = vpop.f32.mrb[9].mxu1  ;;  %v2543_v12 = vpop.eup %2542  ;;  %v847_v13 = vadd.f32 1.0, %v2541_v9  ;;  %2562 = vpow2.f32 %v2047_v5  ;;  %v2452_v49 = vadd.f32 %v3119_v19, %v743_v10  ;;  %v3167_v5 = vld [vmem:[%s3425_s5 + $0x2] ss:$0 sm:$0xff] }
 0x118   : > { %v2545_v14 = vpop.eup %2544  ;;  %v1273_v15 = vadd.f32 1.0, %v2543_v12  ;;  %2564 = vpow2.f32 %v1992_v6  ;;  %v2484_v58 = vadd.f32 %v3121_v21, %v1169_v11  ;;  %v1994_v8 = vmul.f32 -1.442695, %v2450_v45 }
 0x119   : > { %v2547_v16 = vpop.eup %2546  ;;  %2566 = vrcp.f32 %v847_v13  ;;  %v846_v17 = vadd.f32 1.0, %v2545_v14  ;;  %v2270_v18 = vpop.f32.mrb[10].mxu0  ;;  %v2052_v11 = vmul.f32 -1.442695, %v2482_v48  ;;  %v1993_v12 = vmul.f32 -1.442695, %v2452_v49 }
 0x11a   : > { %v2549_v20 = vpop.eup %2548  ;;  %2568 = vrcp.f32 %v1273_v15  ;;  %v1272_v22 = vadd.f32 1.0, %v2547_v16  ;;  %v2330_v23 = vpop.f32.mrb[10].mxu1  ;;  %v2454_v9 = vadd.f32 %v3119_v19, %v2270_v18 }
 0x11b   : > { %v3132_v24 = vpop.f32.mrb[11].mxu0  ;;  %v2551_v25 = vpop.eup %2550  ;;  %2570 = vrcp.f32 %v846_v17  ;;  %v849_v26 = vadd.f32 1.0, %v2549_v20  ;;  %v2486_v13 = vadd.f32 %v3121_v21, %v2330_v23  ;;  %v2051_v17 = vmul.f32 -1.442695, %v2484_v58 }
 0x11c   : > { %v3134_v27 = vpop.f32.mrb[11].mxu1  ;;  %v2553_v28 = vpop.eup %2552  ;;  %2572 = vrcp.f32 %v1272_v22  ;;  %v1275_v29 = vadd.f32 1.0, %v2551_v25  ;;  %v2456_v18 = vadd.f32 %v3119_v19, %v3132_v24 }
 0x11d   : > { %v2555_v30 = vpop.eup %2554  ;;  %2574 = vrcp.f32 %v849_v26  ;;  %v848_v31 = vadd.f32 1.0, %v2553_v28  ;;  %v3136_v32 = vpop.f32.mrb[12].mxu0  ;;  %v2488_v23 = vadd.f32 %v3121_v21, %v3134_v27 }
 0x11e   : > { %v2557_v33 = vpop.eup %2556  ;;  %2576 = vrcp.f32 %v1275_v29  ;;  %v1274_v34 = vadd.f32 1.0, %v2555_v30  ;;  %v3139_v36 = vpop.f32.mrb[12].mxu1  ;;  %v1995_v49 = vmul.f32 -1.442695, %v2456_v18 }
 0x11f   : > { %v3141_v37 = vpop.f32.mrb[13].mxu0  ;;  %v2559_v38 = vpop.eup %2558  ;;  %2578 = vrcp.f32 %v848_v31  ;;  %v851_v39 = vadd.f32 1.0, %v2557_v33  ;;  %v1996_v31 = vmul.f32 -1.442695, %v2454_v9  ;;  %v2490_v24 = vadd.f32 %v3121_v21, %v3139_v36 }
 0x120   : > { %v3144_v41 = vpop.f32.mrb[13].mxu1  ;;  %v2561_v42 = vpop.eup %2560  ;;  %2580 = vrcp.f32 %v1274_v34  ;;  %v1277_v43 = vadd.f32 1.0, %v2559_v38  ;;  %v2054_v38 = vmul.f32 -1.442695, %v2486_v13 }
 0x121   : > { %v2563_v46 = vpop.eup %2562  ;;  %2582 = vrcp.f32 %v851_v39  ;;  %v850_v47 = vadd.f32 1.0, %v2561_v42  ;;  %v3150_v50 = vpop.f32.mrb[14].mxu0  ;;  %v2458_v39 = vadd.f32 %v3119_v19, %v3136_v32 }
 0x122   : > { %v2565_v53 = vpop.eup %2564  ;;  %2584 = vrcp.f32 %v1277_v43  ;;  %v1276_v54 = vadd.f32 1.0, %v2563_v46  ;;  %v3158_v59 = vpop.f32.mrb[14].mxu1 }
 0x123   : > { %v3160_v62 = vpop.f32.mrb[15].mxu0  ;;  %v2567_v63 = vpop.eup %2566  ;;  %2586 = vrcp.f32 %v850_v47  ;;  %v853_v1 = vadd.f32 1.0, %v2565_v53  ;;  %v2053_v53 = vmul.f32 -1.442695, %v2488_v23 }
 0x124   : > { %v3162_v4 = vpop.f32.mrb[15].mxu1  ;;  %v3169_v6 = vpop.eup %2568  ;;  %2588 = vrcp.f32 %v1276_v54 }
 0x125   : > { %v2571_v10 = vpop.eup %2570  ;;  %2590 = vrcp.f32 %v853_v1  ;;  %v2375_v14 = vpop.f32.mrb[16].mxu1  ;;  %v2056_v1 = vmul.f32 -1.442695, %v2490_v24 }
 0x126   : > { %v2343_v15 = vpop.f32.mrb[16].mxu0  ;;  %v3173_v16 = vpop.eup %2572  ;;  %2592 = vpow2.f32 %v2050_v55  ;;  %v1561_v20 = vadd.f32 %v2375_v14, %v3155_v52 }
 0x127   : > { %v1403_v22 = vadd.f32 %v2343_v15, %v3167_v5  ;;  %v1555_v25 = vpop.f32.mrb[17].mxu1  ;;  %v1397_v26 = vpop.f32.mrb[17].mxu0  ;;  %2594 = vpow2.f32 %v1991_v2 }
 0x128   : > { %v2575_v28 = vpop.eup %2574  ;;  %v1556_v29 = vadd.f32 %v3155_v52, %v1555_v25  ;;  %2596 = vpow2.f32 %v2049_v7  ;;  %v1635_v33 = vmul.f32 %v2567_v63, %v1561_v20  ;;  %v1398_v34 = vadd.f32 %v3167_v5, %v1397_v26 }
 0x129   : > { %v3182_v30 = vpop.eup %2576  ;;  %2598 = vpow2.f32 %v1994_v8  ;;  %v2378_v40 = vpop.f32.mrb[18].mxu1  ;;  %v1998_v63 = vmul.f32 -1.442695, %v2458_v39 }
 0x12a   : > { %v2579_v35 = vpop.eup %2578  ;;  %v2346_v27 = vpop.f32.mrb[18].mxu0  ;;  %2600 = vpow2.f32 %v2052_v11  ;;  %v3191_v43 = vadd.f32 %v1635_v33, %v1403_v22  ;;  %v1634_v44 = vmul.f32 %v2571_v10, %v1556_v29  ;;  %v1571_v45 = vadd.f32 %v2378_v40, %v3155_v52 }
 0x12b   : > { %v3189_v42 = vpop.eup %2580  ;;  %v1565_v46 = vpop.f32.mrb[19].mxu1  ;;  %2602 = vpow2.f32 %v1993_v12  ;;  %v1413_v55 = vadd.f32 %v2346_v27, %v3167_v5  ;;  %v2460_v40 = vadd.f32 %v3119_v19, %v3141_v37 }
 0x12c   : > { %v1407_v47 = vpop.f32.mrb[19].mxu0  ;;  %v2583_v48 = vpop.eup %2582  ;;  %2604 = vpow2.f32 %v2051_v17  ;;  %v3196_v36 = vadd.f32 %v1634_v44, %v1398_v34  ;;  %v1637_v54 = vmul.f32 %v2575_v28, %v1571_v45  ;;  %v1566_v10 = vadd.f32 %v3155_v52, %v1565_v46 }
 0x12d   : > { %v3194_v32 = vpop.eup %2584  ;;  %2606 = vpow2.f32 %v1996_v31  ;;  %v2381_v2 = vpop.f32.mrb[20].mxu1  ;;  %v1408_v11 = vadd.f32 %v3167_v5, %v1407_v47 }
 0x12e   : > { %v2587_v58 = vpop.eup %2586  ;;  %v2349_v7 = vpop.f32.mrb[20].mxu0  ;;  %2608 = vpow2.f32 %v2054_v38  ;;  %v3201_v9 = vadd.f32 %v1637_v54, %v1413_v55  ;;  %v1636_v20 = vmul.f32 %v2579_v35, %v1566_v10  ;;  %v1581_v22 = vadd.f32 %v2381_v2, %v3155_v52 }
 0x12f   : > { %v3199_v8 = vpop.eup %2588  ;;  %v1575_v12 = vpop.f32.mrb[21].mxu1  ;;  %2610 = vpow2.f32 %v1995_v49  ;;  %v1423_v25 = vadd.f32 %v2349_v7, %v3167_v5  ;;  %v2492_v7 = vadd.f32 %v3121_v21, %v3144_v41 }
 0x130   : > { %v1417_v13 = vpop.f32.mrb[21].mxu0  ;;  %v2591_v14 = vpop.eup %2590  ;;  %2612 = vpow2.f32 %v2053_v53  ;;  %v3209_v33 = vadd.f32 %v1636_v20, %v1408_v11  ;;  %v1639_v34 = vmul.f32 %v2583_v48, %v1581_v22  ;;  %v1576_v27 = vadd.f32 %v3155_v52, %v1575_v12 }
 0x131   : > { %v2593_v15 = vpop.eup %2592  ;;  %v3205_v17 = vpop.permute.xlu1 %1694  ;;  %2614 = vpow2.f32 %v1998_v63  ;;  %v1418_v48 = vadd.f32 %v3167_v5, %v1417_v13 }
 0x132   : > { %v2595_v26 = vpop.eup %2594  ;;  %v1279_v28 = vadd.f32 1.0, %v2593_v15  ;;  %v2384_v18 = vpop.f32.mrb[22].mxu1  ;;  %2616 = vpow2.f32 %v2056_v1  ;;  %v3218_v47 = vadd.f32 %v1639_v34, %v1423_v25  ;;  %v1638_v54 = vmul.f32 %v2587_v58, %v1576_v27 }
 0x133   : > { %v2352_v23 = vpop.f32.mrb[22].mxu0  ;;  %v2597_v29 = vpop.eup %2596  ;;  %v852_v31 = vadd.f32 1.0, %v2595_v26  ;;  %v1591_v55 = vadd.f32 %v2384_v18, %v3155_v52 }
 0x134   : > { %v1585_v38 = vpop.f32.mrb[23].mxu1  ;;  %v3211_v39 = vpop.f32.mrb[23].mxu0  ;;  %2618 = vrcp.f32 %v1279_v28  ;;  %v1278_v35 = vadd.f32 1.0, %v2597_v29  ;;  %v1433_v10 = vadd.f32 %v2352_v23, %v3167_v5  ;;  %v3225_v20 = vadd.f32 %v1638_v54, %v1418_v48 }
 0x135   : > { %v2599_v24 = vpop.eup %2598  ;;  %2620 = vrcp.f32 %v852_v31  ;;  %v3216_v46 = vpop.permute.xlu0 %1684  ;;  %v1641_v58 = vmul.f32 %v2591_v14, %v1591_v55  ;;  %v1997_v29 = vmul.f32 -1.442695, %v2460_v40  ;;  %v2494_v14 = vadd.f32 %v3121_v21, %v3158_v59 }
 0x136   : > { %v2601_v44 = vpop.eup %2600  ;;  %v855_v45 = vadd.f32 1.0, %v2599_v24  ;;  %2622 = vrcp.f32 %v1278_v35  ;;  %v2387_v63 = vpop.f32.mrb[24].mxu1  ;;  %v2462_v35 = vadd.f32 %v3119_v19, %v3150_v50  ;;  %v1586_v40 = vadd.f32 %v3155_v52, %v1585_v38 }
 0x137   : > { %v2603_v49 = vpop.eup %2602  ;;  %v1281_v53 = vadd.f32 1.0, %v2601_v44  ;;  %v2355_v1 = vpop.f32.mrb[24].mxu0  ;;  %v3229_v41 = vadd.f32 %v1641_v58, %v1433_v10  ;;  %v2496_v50 = vadd.f32 %v3121_v21, %v3162_v4  ;;  %v1428_v10 = vadd.f32 %v3167_v5, %v3211_v39 }
 0x138   : > { %v2605_v37 = vpop.eup %2604  ;;  %2624 = vrcp.f32 %v855_v45  ;;  %v854_v2 = vadd.f32 1.0, %v2603_v49  ;;  %v1595_v11 = vpop.f32.mrb[25].mxu1  ;;  %v2055_v49 = vmul.f32 -1.442695, %v2492_v7  ;;  %v1601_v7 = vadd.f32 %v2387_v63, %v3155_v52 }
 0x139   : > { %v1437_v12 = vpop.f32.mrb[25].mxu0  ;;  %v2607_v15 = vpop.eup %2606  ;;  %2626 = vrcp.f32 %v1281_v53  ;;  %v1280_v13 = vadd.f32 1.0, %v2605_v37  ;;  %v2464_v37 = vadd.f32 %v3119_v19, %v3160_v62  ;;  %v2000_v58 = vmul.f32 -1.442695, %v2462_v35 }
 0x13a   : > { %v2609_v22 = vpop.eup %2608  ;;  %2628 = vrcp.f32 %v854_v2  ;;  %v857_v25 = vadd.f32 1.0, %v2607_v15  ;;  %v3227_v26 = vpop.permute.xlu1 %1699  ;;  %v1443_v4 = vadd.f32 %v2355_v1, %v3167_v5  ;;  %v1596_v39 = vadd.f32 %v3155_v52, %v1595_v11 }
 0x13b   : > { %v2611_v28 = vpop.eup %2610  ;;  %2630 = vrcp.f32 %v1280_v13  ;;  %v1283_v18 = vadd.f32 1.0, %v2609_v22  ;;  %v2390_v23 = vpop.f32.mrb[26].mxu1  ;;  %v2058_v22 = vmul.f32 -1.442695, %v2494_v14 }
 0x13c   : > { %v2358_v31 = vpop.f32.mrb[26].mxu0  ;;  %v2613_v34 = vpop.eup %2612  ;;  %2632 = vrcp.f32 %v857_v25  ;;  %v856_v24 = vadd.f32 1.0, %v2611_v28 }
 0x13d   : > { %v1605_v27 = vpop.f32.mrb[27].mxu1  ;;  %v1447_v44 = vpop.f32.mrb[27].mxu0  ;;  %2634 = vrcp.f32 %v1283_v18  ;;  %v1282_v48 = vadd.f32 1.0, %v2613_v34  ;;  %v1999_v18 = vmul.f32 -1.442695, %v2464_v37 }
 0x13e   : > { %v2615_v45 = vpop.eup %2614  ;;  %2636 = vrcp.f32 %v856_v24  ;;  %v1690_v54 = vpop.permute.xlu0 %1689  ;;  %v2057_v34 = vmul.f32 -1.442695, %v2496_v50  ;;  %v1438_v24 = vadd.f32 %v3167_v5, %v1437_v12 }
 0x13f   : > { %v2617_v53 = vpop.eup %2616  ;;  %v859_v55 = vadd.f32 1.0, %v2615_v45  ;;  %2638 = vrcp.f32 %v1282_v48  ;;  %v2393_v38 = vpop.f32.mrb[28].mxu1  ;;  %v1611_v48 = vadd.f32 %v2390_v23, %v3155_v52  ;;  %v1606_v23 = vadd.f32 %v3155_v52, %v1605_v27 }
 0x140   : > { %v3240_v2 = vpop.eup %2618  ;;  %v1285_v59 = vadd.f32 1.0, %v2617_v53  ;;  %v2361_v15 = vpop.f32.mrb[28].mxu0  ;;  %v3285_v27 = vmul.f32 %v3182_v30, %v3227_v26 }
 0x141   : > { %v2621_v13 = vpop.eup %2620  ;;  %2640 = vrcp.f32 %v859_v55  ;;  %v3245_v25 = vpop.f32.mrb[29].mxu1 }
 0x142   : > { %v3247_v19 = vpop.f32.mrb[29].mxu0  ;;  %v3249_v21 = vpop.eup %2622  ;;  %2642 = vrcp.f32 %v1285_v59  ;;  %v1640_v62 = vmul.f32 %v2621_v13, %v1586_v40 }
 0x143   : > { %v2625_v28 = vpop.eup %2624  ;;  %2644 = vpow2.f32 %v1997_v29  ;;  %v1710_v63 = vpop.permute.xlu1 %1709  ;;  %v1453_v29 = vadd.f32 %v2358_v31, %v3167_v5 }
 0x144   : > { %v3254_v35 = vpop.eup %2626  ;;  %2646 = vpow2.f32 %v2055_v49  ;;  %v3256_v14 = vadd.f32 %v1640_v62, %v1428_v10  ;;  %v1643_v45 = vmul.f32 %v2625_v28, %v1601_v7  ;;  %v3259_v40 = vpop.f32.mrb[30].mxu1  ;;  %v1448_v10 = vadd.f32 %v3167_v5, %v1447_v44 }
 0x145   : > { %v3261_v1 = vpop.f32.mrb[30].mxu0  ;;  %v2629_v11 = vpop.eup %2628  ;;  %2648 = vpow2.f32 %v2000_v58  ;;  %v1621_v58 = vadd.f32 %v2393_v38, %v3155_v52  ;;  %v3300_v30 = vmul.f32 %v3194_v32, %v1710_v63 }
 0x146   : > { %v3264_v53 = vpop.f32.mrb[31].mxu1  ;;  %v3266_v55 = vpop.f32.mrb[31].mxu0  ;;  %2650 = vpow2.f32 %v2058_v22  ;;  %v3270_v49 = vadd.f32 %v1643_v45, %v1443_v4  ;;  %v1642_v37 = vmul.f32 %v2629_v11, %v1596_v39  ;;  %v3281_v22 = vmul.f32 %v3173_v16, %v3216_v46 }
 0x147   : > { %v3268_v12 = vpop.eup %2630  ;;  %v1705_v59 = vpop.permute.xlu0 %1704  ;;  %2652 = vpow2.f32 %v1999_v18  ;;  %v1763_v4 = vmul.f32 %v3169_v6, %v1690_v54  ;;  %v1463_v18 = vadd.f32 %v2361_v15, %v3167_v5  ;;  %v3297_v46 = vmul.f32 %v3189_v42, %v3205_v17 }
 0x148   : > { %v2633_v50 = vpop.eup %2632  ;;  %2654 = vpow2.f32 %v2057_v34  ;;  %v3276_v31 = vadd.f32 %v1642_v37, %v1438_v24  ;;  %v1720_v39 = vpop.permute.xlu1 %1719  ;;  %v1778_v15 = vsub.f32 1.0, %v3281_v22  ;;  %v1781_v42 = vsub.f32 1.0, %v3285_v27 }
 0x149   : > { %v3274_v7 = vpop.eup %2634  ;;  %v1645_v13 = vmul.f32 %v2633_v50, %v1611_v48  ;;  %2656 = vtanh.f32 %v3191_v43  ;;  %v3306_v43 = vmul.f32 %v3199_v8, %v1705_v59  ;;  %v1779_v17 = vsub.f32 1.0, %v1763_v4 }
 0x14a   : > { %v2637_v62 = vpop.eup %2636  ;;  %2658 = vtanh.f32 %v3196_v36  ;;  %v3315_v34 = vmul.f32 %v3240_v2, %v1720_v39  ;;  %v1780_v24 = vsub.f32 1.0, %v3297_v46  ;;  %v1783_v48 = vsub.f32 1.0, %v3300_v30 }
 0x14b   : > { %v3289_v44 = vpop.eup %2638  ;;  %v3292_v28 = vadd.f32 %v1645_v13, %v1453_v29  ;;  %v1644_v38 = vmul.f32 %v2637_v62, %v1606_v23  ;;  %2660 = vtanh.f32 %v3201_v9  ;;  %v1715_v32 = vpop.permute.xlu0 %1714  ;;  %v1794_v23 = vmul.f32 %v1778_v15, %v2959_v51 }
 0x14c   : > { %v2641_v16 = vpop.eup %2640  ;;  %2662 = vtanh.f32 %v3209_v33  ;;  %v1730_v37 = vpop.permute.xlu1 %1729  ;;  %v1796_v62 = vmul.f32 %v1780_v24, %v2981_v57  ;;  %v1799_v39 = vmul.f32 %v1783_v48, %v3011_v0  ;;  %v3340_v57 = vmul.f32 %v3249_v21, %v1715_v32 }
 0x14d   : > { %v3303_v6 = vpop.eup %2642  ;;  %v3309_v36 = vadd.f32 %v1644_v38, %v1448_v10  ;;  %v1647_v26 = vmul.f32 %v2641_v16, %v1621_v58  ;;  %2664 = vtanh.f32 %v3218_v47  ;;  %v1782_v47 = vsub.f32 1.0, %v3306_v43 }
 0x14e   : > { %v2645_v54 = vpop.eup %2644  ;;  %2666 = vtanh.f32 %v3225_v20  ;;  %v1795_v20 = vmul.f32 %v1779_v17, %v2978_v56  ;;  %v1797_v10 = vmul.f32 %v1781_v42, %v2991_v60  ;;  %v1616_v60 = vadd.f32 %v3155_v52, %v3245_v25 }
 0x14f   : > { %v2647_v9 = vpop.eup %2646  ;;  %v858_v63 = vadd.f32 1.0, %v2645_v54  ;;  %v3318_v8 = vadd.f32 %v1647_v26, %v1463_v18  ;;  %2668 = vtanh.f32 %v3229_v41  ;;  %v1785_v41 = vsub.f32 1.0, %v3315_v34  ;;  %v1725_v51 = vpop.permute.xlu0 %1724 }
 0x150   : > { %v2649_v33 = vpop.eup %2648  ;;  %v1284_v45 = vadd.f32 1.0, %v2647_v9  ;;  %v1798_v56 = vmul.f32 %v1782_v47, %v2998_v61  ;;  %v1458_v61 = vadd.f32 %v3167_v5, %v3247_v19  ;;  %v1740_v42 = vpop.permute.xlu1 %1739  ;;  %v3349_v9 = vmul.f32 %v3254_v35, %v1730_v37 }
 0x151   : > { %v2651_v11 = vpop.eup %2650  ;;  %2670 = vrcp.f32 %v858_v63  ;;  %v861_v29 = vadd.f32 1.0, %v2649_v33  ;;  %v1801_v54 = vmul.f32 %v1785_v41, %v3022_v3  ;;  %v1770_v32 = vmul.f32 %v3268_v12, %v1725_v51 }
 0x152   : > { %v2653_v2 = vpop.eup %2652  ;;  %2672 = vrcp.f32 %v1284_v45  ;;  %v1287_v50 = vadd.f32 1.0, %v2651_v11 }
 0x153   : > { %v2655_v59 = vpop.eup %2654  ;;  %2674 = vrcp.f32 %v861_v29  ;;  %v860_v13 = vadd.f32 1.0, %v2653_v2  ;;  %v1786_v2 = vsub.f32 1.0, %v1770_v32 }
 0x154   : > { %v2657_v58 = vpop.eup %2656  ;;  %2676 = vrcp.f32 %v1287_v50  ;;  %v1286_v38 = vadd.f32 1.0, %v2655_v59  ;;  %v2700_v59 = vld [vmem:[%s2943_s25 + $0x30] sm:$0xff] }
 0x155   : > { %v2659_v18 = vpop.eup %2658  ;;  %2678 = vrcp.f32 %v860_v13  ;;  %v1811_v16 = vmul.f32 %v2657_v58, %v1763_v4 }
 0x156   : > { %v2661_v26 = vpop.eup %2660  ;;  %2680 = vrcp.f32 %v1286_v38  ;;  %v1810_v0 = vmul.f32 %v2659_v18, %v3281_v22  ;;  %v2701_v38 = vld [vmem:[%s2943_s25 + $0x48] sm:$0xff] }
 0x157   : > { %v2663_v4 = vpop.eup %2662  ;;  %v1827_v25 = vadd.f32 %v1811_v16, %v1795_v20  ;;  %v1813_v15 = vmul.f32 %v2661_v26, %v3285_v27  ;;  %2682 = vtanh.f32 %v3256_v14  ;;  %v1631_v14 = vadd.f32 %v3259_v40, %v3155_v52 }
 0x158   : > { %v2665_v17 = vpop.eup %2664  ;;  %v1826_v21 = vadd.f32 %v1810_v0, %v1794_v23  ;;  %v1812_v22 = vmul.f32 %v2663_v4, %v3297_v46  ;;  %2684 = vtanh.f32 %v3270_v49  ;;  %v1735_v46 = vpop.permute.xlu0 %1734  ;;  %v1473_v40 = vadd.f32 %v3261_v1, %v3167_v5 }
 0x159   : > { %v2667_v19 = vpop.eup %2666  ;;  %1843 = vst.msk [vmem:[%s3337_s21 + $0x8] sm:$0xff] %vm588_vm1, %v1827_v25  ;;  %v1829_v3 = vadd.f32 %v1813_v15, %v1797_v10  ;;  %v1815_v27 = vmul.f32 %v2665_v17, %v3300_v30  ;;  %2686 = vtanh.f32 %v3276_v31  ;;  %v1772_v48 = vmul.f32 %v3289_v44, %v1735_v46  ;;  %v1750_v1 = vpop.permute.xlu1 %1749 }
 0x15a   : > { %v2669_v35 = vpop.eup %2668  ;;  %1842 = vst.msk [vmem:[%s3337_s21] sm:$0xff] %vm588_vm1, %v1826_v21  ;;  %v1828_v63 = vadd.f32 %v1812_v22, %v1796_v62  ;;  %v1814_v49 = vmul.f32 %v2667_v19, %v3306_v43  ;;  %2688 = vtanh.f32 %v3292_v28  ;;  %v1626_v43 = vadd.f32 %v3155_v52, %v3264_v53  ;;  %v2704_v22 = vld [vmem:[%s2943_s25 + $0x50] sm:$0xff]  ;;  %v2705_v19 = vld [vmem:[%s2943_s25 + $0x68] sm:$0xff] }
 0x15b   : > { %v2671_v33 = vpop.eup %2670  ;;  %1845 = vst.msk [vmem:[%s3337_s21 + $0x18] sm:$0xff] %vm588_vm1, %v1829_v3  ;;  %v1831_v31 = vadd.f32 %v1815_v27, %v1799_v39  ;;  %v1817_v30 = vmul.f32 %v2669_v35, %v3315_v34  ;;  %2690 = vtanh.f32 %v3309_v36  ;;  %v1784_v34 = vsub.f32 1.0, %v3340_v57 }
 0x15c   : > { %v2673_v12 = vpop.eup %2672  ;;  %1844 = vst.msk [vmem:[%s3337_s21 + $0x10] sm:$0xff] %vm588_vm1, %v1828_v63  ;;  %v1830_v24 = vadd.f32 %v1814_v49, %v1798_v56  ;;  %2692 = vtanh.f32 %v3318_v8  ;;  %v1646_v28 = vmul.f32 %v2671_v33, %v1616_v60  ;;  %v1773_v36 = vmul.f32 %v3274_v7, %v1740_v42  ;;  %v1745_v23 = vpop.permute.xlu0 %1744  ;;  %v2702_v60 = vld [vmem:[%s2943_s25 + $0x40] sm:$0xff] }
 0x15d   : > { %v2675_v45 = vpop.eup %2674  ;;  %1847 = vst.msk [vmem:[%s3337_s21 + $0x28] sm:$0xff] %vm588_vm1, %v1831_v31  ;;  %v1833_v11 = vadd.f32 %v1817_v30, %v1801_v54  ;;  %v1775_v8 = vmul.f32 %v3303_v6, %v1750_v1  ;;  %v1468_v53 = vadd.f32 %v3167_v5, %v3266_v55  ;;  %v1787_v7 = vsub.f32 1.0, %v3349_v9  ;;  %v1760_v0 = vpop.permute.xlu1 %1759  ;;  %v2703_v54 = vld [vmem:[%s2943_s25 + $0x58] sm:$0xff] }
 0x15e   : > { %v2677_v47 = vpop.eup %2676  ;;  %1846 = vst.msk [vmem:[%s3337_s21 + $0x20] sm:$0xff] %vm588_vm1, %v1830_v24  ;;  %v1662_v29 = vadd.f32 %v1646_v28, %v1458_v61  ;;  %v1649_v52 = vmul.f32 %v2675_v45, %v1631_v14  ;;  %v1800_v10 = vmul.f32 %v2700_v59, %v1784_v34  ;;  %v1789_v13 = vsub.f32 1.0, %v1773_v36  ;;  %v2707_v34 = vld [vmem:[%s2943_s25 + $0x78] sm:$0xff] }
 0x15f   : > { %v2679_v37 = vpop.eup %2678  ;;  %1849 = vst.msk [vmem:[%s3337_s21 + $0x38] sm:$0xff] %vm588_vm1, %v1833_v11  ;;  %v1788_v41 = vsub.f32 1.0, %v1772_v48  ;;  %v1791_v5 = vsub.f32 1.0, %v1775_v8  ;;  %v1803_v51 = vmul.f32 %v2701_v38, %v1787_v7  ;;  %v1774_v18 = vmul.f32 %v2673_v12, %v1745_v23  ;;  %v2706_v12 = vld [vmem:[%s2943_s25 + $0x60] sm:$0xff] }
 0x160   : > { %v2681_v44 = vpop.eup %2680  ;;  %2694 = vtanh.f32 %v1662_v29  ;;  %v1665_v20 = vadd.f32 %v1649_v52, %v1473_v40  ;;  %v1648_v50 = vmul.f32 %v2679_v37, %v1626_v43  ;;  %v1802_v26 = vmul.f32 %v2702_v60, %v1786_v2  ;;  %v1755_v27 = vpop.permute.xlu0 %1754 }
 0x161   : > { %v2683_v6 = vpop.eup %2682  ;;  %v1805_v25 = vmul.f32 %v2703_v54, %v1789_v13  ;;  %v1777_v15 = vmul.f32 %v2677_v47, %v1760_v0  ;;  %v1807_v3 = vmul.f32 %v2705_v19, %v1791_v5  ;;  %v1776_v46 = vmul.f32 %v2681_v44, %v1755_v27  ;;  %v2708_v47 = vld [vmem:[%s2943_s25 + $0x70] sm:$0xff] }
 0x162   : > { %v2685_v58 = vpop.eup %2684  ;;  %v1816_v55 = vmul.f32 %v2683_v6, %v3340_v57  ;;  %2696 = vtanh.f32 %v1665_v20  ;;  %v1664_v62 = vadd.f32 %v1648_v50, %v1468_v53 }
 0x163   : > { %v2687_v39 = vpop.eup %2686  ;;  %v1819_v56 = vmul.f32 %v2685_v58, %v3349_v9  ;;  %v1804_v9 = vmul.f32 %v2704_v22, %v1788_v41  ;;  %v1793_v31 = vsub.f32 1.0, %v1777_v15  ;;  %v1792_v28 = vsub.f32 1.0, %v1776_v46 }
 0x164   : > { %v2689_v16 = vpop.eup %2688  ;;  %v1832_v61 = vadd.f32 %v1816_v55, %v1800_v10  ;;  %v1818_v4 = vmul.f32 %v2687_v39, %v1770_v32  ;;  %2698 = vtanh.f32 %v1664_v62  ;;  %v1790_v32 = vsub.f32 1.0, %v1774_v18 }
 0x165   : > { %v2691_v57 = vpop.eup %2690  ;;  %v1835_v42 = vadd.f32 %v1819_v56, %v1803_v51  ;;  %v1821_v17 = vmul.f32 %v2689_v16, %v1773_v36  ;;  %v1809_v36 = vmul.f32 %v2707_v34, %v1793_v31 }
 0x166   : > { %v2693_v21 = vpop.eup %2692  ;;  %1848 = vst.msk [vmem:[%s3337_s21 + $0x30] sm:$0xff] %vm588_vm1, %v1832_v61  ;;  %v1834_v14 = vadd.f32 %v1818_v4, %v1802_v26  ;;  %v1820_v35 = vmul.f32 %v2691_v57, %v1772_v48  ;;  %v1806_v24 = vmul.f32 %v2706_v12, %v1790_v32 }
 0x167   : > { %1851 = vst.msk [vmem:[%s3337_s21 + $0x48] sm:$0xff] %vm588_vm1, %v1835_v42  ;;  %v1837_v63 = vadd.f32 %v1821_v17, %v1805_v25  ;;  %v1823_v49 = vmul.f32 %v2693_v21, %v1775_v8  ;;  %v1808_v8 = vmul.f32 %v2708_v47, %v1792_v28 }
 0x168   : > { %1850 = vst.msk [vmem:[%s3337_s21 + $0x40] sm:$0xff] %vm588_vm1, %v1834_v14  ;;  %v1836_v33 = vadd.f32 %v1820_v35, %v1804_v9 }
 0x169   : > { %1853 = vst.msk [vmem:[%s3337_s21 + $0x58] sm:$0xff] %vm588_vm1, %v1837_v63  ;;  %v1839_v30 = vadd.f32 %v1823_v49, %v1807_v3 }
 0x16a   : > { %v2695_v40 = vpop.eup %2694  ;;  %1852 = vst.msk [vmem:[%s3337_s21 + $0x50] sm:$0xff] %vm588_vm1, %v1836_v33 }
 0x16b   : > { %1855 = vst.msk [vmem:[%s3337_s21 + $0x68] sm:$0xff] %vm588_vm1, %v1839_v30  ;;  %v1822_v43 = vmul.f32 %v2695_v40, %v1774_v18 }
 0x16c   : > { %v2697_v45 = vpop.eup %2696 }
 0x16d   : > { %v1838_v48 = vadd.f32 %v1822_v43, %v1806_v24  ;;  %v1825_v1 = vmul.f32 %v2697_v45, %v1777_v15 }
 0x16e   : > { %v2699_v11 = vpop.eup %2698 }
 0x16f   : > { %1854 = vst.msk [vmem:[%s3337_s21 + $0x60] sm:$0xff] %vm588_vm1, %v1838_v48  ;;  %v1841_v29 = vadd.f32 %v1825_v1, %v1809_v36  ;;  %v1824_v52 = vmul.f32 %v2699_v11, %v1776_v46 }
 0x171   : > { %1857 = vst.msk [vmem:[%s3337_s21 + $0x78] sm:$0xff] %vm588_vm1, %v1841_v29  ;;  %v1840_v53 = vadd.f32 %v1824_v52, %v1808_v8 }
 0x173   : > { %1856 = vst.msk [vmem:[%s3337_s21 + $0x70] sm:$0xff] %vm588_vm1, %v1840_v53 }
 0x174 PF: > { %s17_s24 = sadd.s32 1, %s2715_s24  }
 0x175   : > { %p14_p4 = scmp.ge.s32.totalorder %s17_s24, 4  }
 0x177   :  { %16 = sbr.rel (!%p14_p4) target bundleno = 1 (0x1), region = 92 }

</bundles_post_ra>
